<compile_context>
chip_gen: v6e
topology: v6e:2x2x1
jax: 0.10.0
libtpu: 0.0.40
codegen_flags: <defaults>
</compile_context>

<pallas_src>
import jax
import jax.numpy as jnp
from jax.experimental import pallas as pl
from jax.experimental.pallas import tpu as pltpu


def _round_up(x, m):
    return (x + m - 1) // m * m


# --------------------------------------------------------------------------
# Phase 1: compute the (1, E) meta weight vector from the source entities.
# --------------------------------------------------------------------------
def meta_weight_kernel(src_ref, aw1_ref, ab1_ref, aw2r_ref, ab2_ref,
                       mw1_ref, mb1_ref, mw2_ref, mb2_ref, w_ref):
    src = src_ref[...]                                                # (N, E)

    # ---- attnet: Linear(E, H) -> ReLU ----
    h = jnp.dot(src, aw1_ref[...], preferred_element_type=jnp.float32)
    h = jnp.maximum(h + ab1_ref[...], 0.0)                            # (N, H)

    # ---- attnet second layer: H -> 1 as VPU multiply + lane reduce
    #      (avoids a 1-output-lane MXU matmul on a serial chain) ----
    # ab2 is mathematically a no-op under the softmax below; kept for exactness.
    scores = (jnp.sum(h * aw2r_ref[...], axis=-1, keepdims=True)
              + ab2_ref[...])                                         # (N, 1)

    # ---- softmax over dim 0 (entities) ----
    m = jnp.max(scores, axis=0, keepdims=True)
    e = jnp.exp(scores - m)
    atts = e / jnp.sum(e, axis=0, keepdims=True)                      # (N, 1)

    # ---- fea_emb = sum(atts * src, dim=0) ----
    fea = jnp.sum(atts * src, axis=0, keepdims=True)                  # (1, E)

    # ---- metanet: Linear(E, M) -> ReLU -> Linear(M, E) ----
    mh = jnp.dot(fea, mw1_ref[...], preferred_element_type=jnp.float32)
    mh = jnp.maximum(mh + mb1_ref[...], 0.0)                          # (1, M)
    w_ref[...] = (jnp.dot(mh, mw2_ref[...], preferred_element_type=jnp.float32)
                  + mb2_ref[...])                                     # (1, E)


# --------------------------------------------------------------------------
# Phase 2: lane-dense batch scoring, gridded/tiled over B.
# --------------------------------------------------------------------------
def score_kernel(w_ref, bt_ref, out_ref):
    bt = bt_ref[...]                                                  # (E, Bt)
    w = w_ref[...].astype(bt.dtype)                                   # (1, E)
    r = jnp.dot(w, bt, preferred_element_type=jnp.float32)            # (1, Bt)
    out_ref[...] = jax.nn.sigmoid(r) * 5.0                            # lane-dense store


def reward_function_forward(src_entities_emb, batch_entity_emb, params,
                            *, batch_dtype=jnp.bfloat16, b_tile=None):
    """Returns rewards_re of shape (B,): sigmoid(batch @ metaNetwork(src)) * 5."""
    aw1, ab1, aw2, ab2, mw1, mb1, mw2, mb2 = params
    E = src_entities_emb.shape[1]
    B = batch_entity_emb.shape[0]

    # aw2 stored (H, 1); present it as a (1, H) row for the VPU reduce.
    aw2_row = aw2.reshape(1, -1)

    vmem = pl.BlockSpec(memory_space=pltpu.MemorySpace.VMEM)
    weight = pl.pallas_call(
        meta_weight_kernel,
        out_shape=jax.ShapeDtypeStruct((1, E), jnp.float32),
        in_specs=[vmem] * 9,
        out_specs=vmem,
    )(src_entities_emb, aw1, ab1, aw2_row, ab2, mw1, mb1, mw2, mb2)

    # ---- lane-dense, tiled scoring over B ----
    if b_tile is None:
        # 128-aligned tiles; cap keeps double-buffered tiles small enough for
        # v7x's 64 MiB VMEM with plenty of headroom.
        b_tile = min(_round_up(B, 128), 8192)
    b_pad = _round_up(B, b_tile)

    # Transpose in the wrapper so the kernel output is (1, B) lane-dense.
    bt = batch_entity_emb.astype(batch_dtype).T                       # (E, B)
    if b_pad != B:
        bt = jnp.pad(bt, ((0, 0), (0, b_pad - B)))

    itemsize = jnp.dtype(batch_dtype).itemsize
    cost = pl.CostEstimate(
        flops=2 * b_pad * E,
        transcendentals=b_pad,                      # sigmoid
        bytes_accessed=b_pad * E * itemsize + E * 4 + b_pad * 4,
    )

    out = pl.pallas_call(
        score_kernel,
        out_shape=jax.ShapeDtypeStruct((1, b_pad), jnp.float32),
        grid=(b_pad // b_tile,),
        in_specs=[
            pl.BlockSpec((1, E), lambda i: (0, 0)),        # weight: resident
            pl.BlockSpec((E, b_tile), lambda i: (0, i)),   # batch_T: tiled over B
        ],
        out_specs=pl.BlockSpec((1, b_tile), lambda i: (0, i)),
        compiler_params=pltpu.CompilerParams(
            dimension_semantics=("parallel",),             # v7x megacore split
            vmem_limit_bytes=32 * 1024 * 1024,
        ),
        cost_estimate=cost,
    )(weight, bt)

    return out[0, :B]


# --------------------------------------------------------------------------
# Parameters / reference
# --------------------------------------------------------------------------
def init_params(key, emb_dim, meta_dim, att_hidden_dim):
    """Deterministic synthetic parameter init (PyTorch Linear shapes, stored (in,out))."""
    ks = jax.random.split(key, 8)
    scale = 0.1
    aw1 = scale * jax.random.normal(ks[0], (emb_dim, att_hidden_dim), jnp.float32)
    ab1 = scale * jax.random.normal(ks[1], (1, att_hidden_dim), jnp.float32)
    aw2 = scale * jax.random.normal(ks[2], (att_hidden_dim, 1), jnp.float32)
    ab2 = scale * jax.random.normal(ks[3], (1, 1), jnp.float32)
    mw1 = scale * jax.random.normal(ks[4], (emb_dim, meta_dim), jnp.float32)
    mb1 = scale * jax.random.normal(ks[5], (1, meta_dim), jnp.float32)
    mw2 = scale * jax.random.normal(ks[6], (meta_dim, emb_dim), jnp.float32)
    mb2 = scale * jax.random.normal(ks[7], (1, emb_dim), jnp.float32)
    return (aw1, ab1, aw2, ab2, mw1, mb1, mw2, mb2)


def reward_function_ref(src, batch, params):
    """Pure-JAX reference for sanity checking."""
    aw1, ab1, aw2, ab2, mw1, mb1, mw2, mb2 = params
    h = jnp.maximum(src @ aw1 + ab1, 0.0)
    s = h @ aw2 + ab2
    atts = jax.nn.softmax(s, axis=0)
    fea = jnp.sum(atts * src, axis=0, keepdims=True)
    mh = jnp.maximum(fea @ mw1 + mb1, 0.0)
    w = mh @ mw2 + mb2
    r = (batch @ w.T)[:, 0]
    return jax.nn.sigmoid(r) * 5.0


if __name__ == "__main__":
    # Small shapes consistent with the module's forward.
    emb_dim, meta_dim, att_hidden_dim = 32, 16, 16
    N, B = 8, 16   # N source entities, B batch entities to score

    key = jax.random.PRNGKey(0)
    k_src, k_batch, k_params = jax.random.split(key, 3)

    src_entities_emb = jax.random.normal(k_src, (N, emb_dim), jnp.float32)
    batch_entity_emb = jax.random.normal(k_batch, (B, emb_dim), jnp.float32)
    params = init_params(k_params, emb_dim, meta_dim, att_hidden_dim)

    ref = reward_function_ref(src_entities_emb, batch_entity_emb, params)

    # f32 batch path: must match the reference tightly.
    rewards_f32 = reward_function_forward(src_entities_emb, batch_entity_emb,
                                          params, batch_dtype=jnp.float32)
    jax.block_until_ready(rewards_f32)
    assert rewards_f32.shape == (B,)
    assert jnp.allclose(rewards_f32, ref, atol=1e-5, rtol=1e-5)

    # Default bf16 batch path (halves HBM traffic on the only B-scaled operand);
    # f32 accumulation + f32 sigmoid, so only a small bf16 roundoff remains.
    rewards_bf16 = reward_function_forward(src_entities_emb, batch_entity_emb, params)
    jax.block_until_ready(rewards_bf16)
    assert rewards_bf16.shape == (B,)
    assert jnp.allclose(rewards_bf16, ref, atol=5e-2, rtol=5e-2)

    print("KERNEL_OK")
</pallas_src>

<mosaic_0001>
module attributes {stable_mosaic.version = 11 : i64} {
  func.func @meta_weight_kernel(%arg0: memref<8x32xf32, #tpu.memory_space<vmem>>, %arg1: memref<32x16xf32, #tpu.memory_space<vmem>>, %arg2: memref<1x16xf32, #tpu.memory_space<vmem>>, %arg3: memref<1x16xf32, #tpu.memory_space<vmem>>, %arg4: memref<1x1xf32, #tpu.memory_space<vmem>>, %arg5: memref<32x16xf32, #tpu.memory_space<vmem>>, %arg6: memref<1x16xf32, #tpu.memory_space<vmem>>, %arg7: memref<16x32xf32, #tpu.memory_space<vmem>>, %arg8: memref<1x32xf32, #tpu.memory_space<vmem>>, %arg9: memref<1x32xf32, #tpu.memory_space<vmem>>) attributes {dimension_semantics = [], scalar_prefetch = 0 : i64, scratch_operands = 0 : i64, tpu.core_type = #tpu.core_type<tc>} {
    %c0 = arith.constant 0 : index
    %c0_0 = arith.constant 0 : index
    %0 = vector.load %arg0[%c0, %c0_0] : memref<8x32xf32, #tpu.memory_space<vmem>>, vector<8x32xf32>
    %c0_1 = arith.constant 0 : index
    %c0_2 = arith.constant 0 : index
    %1 = vector.load %arg1[%c0_1, %c0_2] : memref<32x16xf32, #tpu.memory_space<vmem>>, vector<32x16xf32>
    %cst = arith.constant dense<0.000000e+00> : vector<8x16xf32>
    %2 = tpu.matmul %0, %1, %cst {dimension_numbers = #tpu.dot_dimension_numbers<[1], [0], [0], [1], [0, 0, 1, 1], [], []>} : vector<8x32xf32>, vector<32x16xf32>, vector<8x16xf32> -> vector<8x16xf32>
    %c0_3 = arith.constant 0 : index
    %c0_4 = arith.constant 0 : index
    %3 = vector.load %arg2[%c0_3, %c0_4] : memref<1x16xf32, #tpu.memory_space<vmem>>, vector<1x16xf32>
    %4 = vector.broadcast %3 : vector<1x16xf32> to vector<8x16xf32>
    %5 = arith.addf %2, %4 : vector<8x16xf32>
    %cst_5 = arith.constant 0.000000e+00 : f32
    %6 = vector.broadcast %cst_5 : f32 to vector<8x16xf32>
    %7 = arith.maximumf %5, %6 : vector<8x16xf32>
    %c0_6 = arith.constant 0 : index
    %c0_7 = arith.constant 0 : index
    %8 = vector.load %arg3[%c0_6, %c0_7] : memref<1x16xf32, #tpu.memory_space<vmem>>, vector<1x16xf32>
    %9 = vector.broadcast %8 : vector<1x16xf32> to vector<8x16xf32>
    %10 = arith.mulf %7, %9 : vector<8x16xf32>
    %cst_8 = arith.constant dense<0.000000e+00> : vector<8xf32>
    %11 = vector.multi_reduction <add>, %10, %cst_8 [1] : vector<8x16xf32> to vector<8xf32>
    %12 = vector.shape_cast %11 : vector<8xf32> to vector<8x1xf32>
    %c0_9 = arith.constant 0 : index
    %c0_10 = arith.constant 0 : index
    %13 = vector.load %arg4[%c0_9, %c0_10] : memref<1x1xf32, #tpu.memory_space<vmem>>, vector<1x1xf32>
    %14 = vector.broadcast %13 : vector<1x1xf32> to vector<8x1xf32>
    %15 = arith.addf %12, %14 : vector<8x1xf32>
    %cst_11 = arith.constant dense<0xFF800000> : vector<1xf32>
    %16 = vector.multi_reduction <maximumf>, %15, %cst_11 [0] : vector<8x1xf32> to vector<1xf32>
    %17 = vector.shape_cast %16 : vector<1xf32> to vector<1x1xf32>
    %18 = vector.broadcast %17 : vector<1x1xf32> to vector<8x1xf32>
    %19 = arith.subf %15, %18 : vector<8x1xf32>
    %20 = math.exp %19 : vector<8x1xf32>
    %cst_12 = arith.constant dense<0.000000e+00> : vector<1xf32>
    %21 = vector.multi_reduction <add>, %20, %cst_12 [0] : vector<8x1xf32> to vector<1xf32>
    %22 = vector.shape_cast %21 : vector<1xf32> to vector<1x1xf32>
    %23 = vector.broadcast %22 : vector<1x1xf32> to vector<8x1xf32>
    %24 = arith.divf %20, %23 : vector<8x1xf32>
    %25 = vector.broadcast %24 : vector<8x1xf32> to vector<8x32xf32>
    %26 = arith.mulf %25, %0 : vector<8x32xf32>
    %cst_13 = arith.constant dense<0.000000e+00> : vector<32xf32>
    %27 = vector.multi_reduction <add>, %26, %cst_13 [0] : vector<8x32xf32> to vector<32xf32>
    %28 = vector.shape_cast %27 : vector<32xf32> to vector<1x32xf32>
    %c0_14 = arith.constant 0 : index
    %c0_15 = arith.constant 0 : index
    %29 = vector.load %arg5[%c0_14, %c0_15] : memref<32x16xf32, #tpu.memory_space<vmem>>, vector<32x16xf32>
    %cst_16 = arith.constant dense<0.000000e+00> : vector<1x16xf32>
    %30 = tpu.matmul %28, %29, %cst_16 {dimension_numbers = #tpu.dot_dimension_numbers<[1], [0], [0], [1], [0, 0, 1, 1], [], []>} : vector<1x32xf32>, vector<32x16xf32>, vector<1x16xf32> -> vector<1x16xf32>
    %c0_17 = arith.constant 0 : index
    %c0_18 = arith.constant 0 : index
    %31 = vector.load %arg6[%c0_17, %c0_18] : memref<1x16xf32, #tpu.memory_space<vmem>>, vector<1x16xf32>
    %32 = arith.addf %30, %31 : vector<1x16xf32>
    %cst_19 = arith.constant 0.000000e+00 : f32
    %33 = vector.broadcast %cst_19 : f32 to vector<1x16xf32>
    %34 = arith.maximumf %32, %33 : vector<1x16xf32>
    %c0_20 = arith.constant 0 : index
    %c0_21 = arith.constant 0 : index
    %35 = vector.load %arg7[%c0_20, %c0_21] : memref<16x32xf32, #tpu.memory_space<vmem>>, vector<16x32xf32>
    %cst_22 = arith.constant dense<0.000000e+00> : vector<1x32xf32>
    %36 = tpu.matmul %34, %35, %cst_22 {dimension_numbers = #tpu.dot_dimension_numbers<[1], [0], [0], [1], [0, 0, 1, 1], [], []>} : vector<1x16xf32>, vector<16x32xf32>, vector<1x32xf32> -> vector<1x32xf32>
    %c0_23 = arith.constant 0 : index
    %c0_24 = arith.constant 0 : index
    %37 = vector.load %arg8[%c0_23, %c0_24] : memref<1x32xf32, #tpu.memory_space<vmem>>, vector<1x32xf32>
    %38 = arith.addf %36, %37 : vector<1x32xf32>
    %c0_25 = arith.constant 0 : index
    %c0_26 = arith.constant 0 : index
    %39 = vector.load %arg9[%c0_25, %c0_26] : memref<1x32xf32, #tpu.memory_space<vmem>>, vector<1x32xf32>
    tpu.vector_store %arg9[%c0_25, %c0_26], %38 {strides = array<i32>} : memref<1x32xf32, #tpu.memory_space<vmem>>, vector<1x32xf32>,
    return
  }
}

</mosaic_0001>

<bundles_post_ra>
// kernel: tpu_custom_call.1
= control target key start
LH: loop header
LB: loop body
LE: loop exit
PB: predicated region body
PF: predicated region fallthrough
CT: control target
= control target key end

     0   :  { %s551_s0 = inlined_call_operand.vmem [shape: f32[8,32], index: 0, kind: input, shape index: {}]   ;;  %s552_s1 = inlined_call_operand.vmem [shape: f32[32,16], index: 1, kind: input, shape index: {}]   ;;  %s553_s2 = inlined_call_operand.vmem [shape: f32[1,16], index: 2, kind: input, shape index: {}]   ;;  %s554_s3 = inlined_call_operand.vmem [shape: f32[1,16], index: 3, kind: input, shape index: {}]   ;;  %s555_s4 = inlined_call_operand.<no memory space> [shape: f32[1,1], index: 4, kind: input, shape index: {}]   ;;  %s556_s5 = inlined_call_operand.vmem [shape: f32[32,16], index: 5, kind: input, shape index: {}]   ;;  %s557_s6 = inlined_call_operand.vmem [shape: f32[1,16], index: 6, kind: input, shape index: {}]   ;;  %s558_s7 = inlined_call_operand.vmem [shape: f32[16,32], index: 7, kind: input, shape index: {}]   ;;  %s559_s8 = inlined_call_operand.vmem [shape: f32[1,32], index: 8, kind: input, shape index: {}]   ;;  %s560_s9 = inlined_call_operand.hbm [shape: f32[1,32], index: 9, kind: output, shape index: {}]  }
   0x1   :  { %v14_v0 = vstv %s555_s4 }
   0x2   :  { %15 = vst [vmem:[#allocation2] sm:$0x1] %v14_v0 }
   0x3   :  { %v39_v1 = vld [vmem:[%s552_s1 + $0x18] sm:$0xff]  ;;  %v425_v2 = vmov 0.0   ;;  %v38_v3 = vld [vmem:[%s552_s1 + $0x10] sm:$0xff]  ;;  %vm426_vm0 = vmmov 0  }
   0x4   :  { %365 = vmatprep.subr.mxu0 %v425_v2  ;;  %373 = vmatprep.mubr.msk.f32.mxu0 %vm426_vm0, %v425_v2 }
   0x5   :  { %366 = vmatpush3.msra.mxu0 %v39_v1  ;;  %376 = vmatprep.subr.mxu1 %v425_v2 }
   0x6   :  { %16 = vsyncpa [#allocation4], 0  ;;  %367 = vmatprep.subr.mxu0 %v425_v2  ;;  %v37_v4 = vld [vmem:[%s552_s1 + $0x8] sm:$0xff]  ;;  %384 = vmatprep.mubr.msk.f32.mxu1 %vm426_vm0, %v425_v2  ;;  %v36_v5 = vld [vmem:[%s552_s1] sm:$0xff]  ;;  %vm47_vm1 = vcmask 261120   ;;  %vm130_vm2 = vcmask 130048  }
   0x7   :  { %368 = vmatpush3.msra.mxu0 %v38_v3  ;;  %v35_v6 = vld [vmem:[%s551_s0] sm:$0xff]  ;;  %v427_v15 = vmov 0   ;;  %vm142_vm3 = vcmask 7168   ;;  %v178_v38 = vld [vmem:[%s556_s5 + $0x18] sm:$0xff]  ;;  %v177_v39 = vld [vmem:[%s556_s5 + $0x10] sm:$0xff]  ;;  %s428_s14 = smov [#allocation3]  }
   0x8   :  { %369 = vmatprep.subr.mxu0 %v425_v2  ;;  %v346_v7 = vld [vmem:[%s553_s2] ss:$0 sm:$0xff]  ;;  %398 = vset.pattern.permute.xlu0 %v427_v15  ;;  %v176_v40 = vld [vmem:[%s556_s5 + $0x8] sm:$0xff]  ;;  %s338_s4 = sshll.u32 %s428_s14, 4  ;;  %vm330_vm4 = vcmask 253952   ;;  %s339_s4 = int_to_ptr.vmem [resolvable:$true] %s338_s4 }
   0x9   :  { %370 = vmatpush3.msra.mxu0 %v37_v4  ;;  %v348_v11 = vld [vmem:[%s554_s3] ss:$0 sm:$0xff]  ;;  %377 = vmatpush3.msra.mxu1 %v178_v38  ;;  %v255_v51 = vld [vmem:[%s558_s7 + $0x8] sm:$0xff]  ;;  %p408_p1 = scmp.lt.s32.totalorder %s339_s4, %s339_s4 }
   0xa   :  { %371 = vmatprep.subr.mxu0 %v425_v2  ;;  %v349_v16 = vld [vmem:[#allocation2] ss:$0 sm:$0xff]  ;;  %378 = vmatprep.subr.mxu1 %v425_v2 }
   0xb   :  { %372 = vmatpush3.msra.mxu0 %v36_v5  ;;  %379 = vmatpush3.msra.mxu1 %v177_v39  ;;  %v175_v41 = vld [vmem:[%s556_s5] sm:$0xff] }
   0xc   :  { %374 = vmatmul.mubr.msk.f32.vlgmr.msra.gmra.mxu0 %vm47_vm1, %v35_v6  ;;  %387 = vmatprep.subr.mxu0 %v425_v2  ;;  %v254_v52 = vld [vmem:[%s558_s7] sm:$0xff]  ;;  %s403_s7 = scalar_lea.vmem %s339_s4, 16 }
   0xd   :  { %391 = vmatprep.mubr.msk.f32.mxu0 %vm426_vm0, %v425_v2  ;;  %380 = vmatprep.subr.mxu1 %v425_v2  ;;  %v179_v53 = vld [vmem:[%s557_s6] sm:$0x1]  ;;  %p404_p0 = scmp.ne.s32.totalorder %s339_s4, %s403_s7  ;;  %s407_s6 = scalar_lea.vmem %s339_s4, 32 }
   0xe   :  { %381 = vmatpush3.msra.mxu1 %v176_v40  ;;  %388 = vmatpush3.msra.mxu0 %v255_v51  ;;  %v256_v58 = vld [vmem:[%s559_s8] sm:$0x1]  ;;  %p409_p2 = scmp.lt.s32.totalorder %s407_s6, %s403_s7 }
   0xf   :  { %382 = vmatprep.subr.mxu1 %v425_v2  ;;  %389 = vmatprep.subr.mxu0 %v425_v2 }
  0x10   :  { %383 = vmatpush3.msra.mxu1 %v175_v41  ;;  %390 = vmatpush3.msra.mxu0 %v254_v52  ;;  %p410_p3 = por %p409_p2, %p408_p1 }
  0x12   :  { %p411_p4 = pnand %p410_p3, %p404_p0 }
  0xcc   :  { %v117_v8 = vpop.f32.mrf.mxu0 }
  0xcd   :  { %v118_v9 = vadd.f32 %v346_v7, %v117_v8 }
  0xce   :  { %v375_v10 = vpop.f32.mrf.mxu0 }
  0xcf   :  { %v121_v12 = vmax.f32 %v118_v9, 0.0 }
  0xd1   :  { %v129_v13 = vmul.f32 %v348_v11, %v121_v12 }
  0xd3   :  { %v131_v14 = vsel %vm130_vm2, %v129_v13, 0.0 }
  0xd4   :  { %132 = vadd.xlane.f32.xlu0 %v131_v14 }
 0x15d   :  { %v133_v17 = vpop.xlane.xlu0 %132 }
 0x15e   :  { %v141_v18 = vadd.f32 %v349_v16, %v133_v17 }
 0x160   :  { %v143_v19 = vsel %vm142_vm3, %v141_v18, -inf }
 0x161   :  { %v144_v20 = vrot.slane %v143_v19, 4 }
 0x163   :  { %v145_v21 = vmax.f32 %v143_v19, %v144_v20 }
 0x165   :  { %v146_v22 = vrot.slane %v145_v21, 2 }
 0x167   :  { %v147_v23 = vmax.f32 %v145_v21, %v146_v22 }
 0x169   :  { %v148_v24 = vrot.slane %v147_v23, 1 }
 0x16b   :  { %v149_v25 = vmax.f32 %v147_v23, %v148_v24 }
 0x16d   :  { %v150_v26 = vsub.f32 %v141_v18, %v149_v25 }
 0x16f   :  { %v151_v27 = vmul.f32 1.442695, %v150_v26 }
 0x171   :  { %399 = vpow2.f32 %v151_v27 }
 0x17e   :  { %v400_v28 = vpop.eup %399 }
 0x17f   :  { %v153_v29 = vsel %vm142_vm3, %v400_v28, 0.0 }
 0x180   :  { %v154_v30 = vrot.slane %v153_v29, 4 }
 0x182   :  { %v155_v31 = vadd.f32 %v154_v30, %v153_v29 }
 0x184   :  { %v156_v32 = vrot.slane %v155_v31, 2 }
 0x186   :  { %v157_v33 = vadd.f32 %v156_v32, %v155_v31 }
 0x188   :  { %v158_v34 = vrot.slane %v157_v33, 1 }
 0x18a   :  { %v159_v35 = vadd.f32 %v158_v34, %v157_v33 }
 0x18c   :  { %401 = vrcp.f32 %v159_v35 }
 0x199   :  { %v402_v36 = vpop.eup %401 }
 0x19a   :  { %v161_v37 = vmul.f32 %v402_v36, %v400_v28 }
 0x19c   :  { %164 = vperm.xlu0 %398, %v161_v37  }
 0x217   :  { %v165_v42 = vpop.permute.xlu0 %164 }
 0x218   :  { %v167_v43 = vmul.f32 %v165_v42, %v35_v6 }
 0x21a   :  { %v168_v44 = vsel %vm47_vm1, %v167_v43, 0.0 }
 0x21b   :  { %v169_v45 = vrot.slane %v168_v44, 4 }
 0x21d   :  { %v170_v46 = vadd.f32 %v169_v45, %v168_v44 }
 0x21f   :  { %v171_v47 = vrot.slane %v170_v46, 2 }
 0x221   :  { %v172_v48 = vadd.f32 %v171_v47, %v170_v46 }
 0x223   :  { %v173_v49 = vrot.slane %v172_v48, 1 }
 0x225   :  { %v174_v50 = vadd.f32 %v173_v49, %v172_v48 }
 0x227   :  { %385 = vmatmul.mubr.msk.f32.vlgmr.msra.gmra.mxu1 %vm47_vm1, %v174_v50 }
 0x2e7   :  { %v249_v54 = vpop.f32.mrf.mxu1 }
 0x2e8   :  { %v250_v55 = vadd.f32 %v249_v54, %v179_v53 }
 0x2e9   :  { %v386_v56 = vpop.f32.mrf.mxu1 }
 0x2ea   :  { %v253_v57 = vmax.f32 %v250_v55, 0.0 }
 0x2ec   :  { %392 = vmatmul.mubr.msk.f32.vlgmr.msra.gmra.mxu0 %vm130_vm2, %v253_v57 }
 0x3ac   :  { %v326_v59 = vpop.f32.mrf.mxu0 }
 0x3ad   :  { %v327_v60 = vadd.f32 %v326_v59, %v256_v58 }
 0x3ae   :  { %v393_v61 = vpop.f32.mrf.mxu0 }
 0x3af   :  { %331 = vst.msk [vmem:[#allocation3] sm:$0x1] %vm330_vm4, %v327_v60 }
 0x3b0   :  { %414 = shalt.err (!%p411_p4)
}
 0x3b1   :  { %341 = dma.vmem_to_hbm [thread:$0]  %s339_s4, 16, %s560_s9, [#allocation4]  }
 0x3b2   :  { %423 = dma.done.wait [#allocation4], 16  }
 0x3b3   :  { %424 = vsyncadd [#allocation4], 4294967280 }
 0x3b4   :  { %345 = vsyncpa [#allocation4], 1 }

</bundles_post_ra>
